<compile_context>
chip_gen: v6e
topology: v6e:2x2x1
jax: 0.10.0
libtpu: 0.0.40
codegen_flags: <defaults>
</compile_context>

<pallas_src>
import jax
import jax.numpy as jnp
from jax.experimental import pallas as pl
from jax.experimental.pallas import tpu as pltpu
import numpy as np


def gat_fused_kernel(xd_ref, xs_ref, ef_ref,
                     p1_ref, p2_ref, ad_ref, hmap_ref,
                     out_ref):
    # xd_ref  : [Tn, Dn]           destination-node features for this tile      (bf16)
    # xs_ref  : [Tn*K, Dn]         source-node features, one row per in-edge    (bf16)
    # ef_ref  : [Tn*K, De_in]      raw edge features                            (bf16)
    # p1_ref  : [Dn,    HDo + H]   [ fc_n@fc2a | fc_n@attn_src ]  packed lanes  (bf16)
    # p2_ref  : [De_in, HDo + H]   [ fc_e@fc2b | fc_e@attn_edge ] packed lanes  (bf16)
    # ad_ref  : [Dn, H]            fc_n @ attn_dst                              (bf16)
    # hmap_ref: [H, HDo] f32       0/1 head -> lane-slab expansion matrix
    # out_ref : [Tn, HDo] f32
    xd = xd_ref[...]
    xs = xs_ref[...]
    ef = ef_ref[...]

    tn = xd.shape[0]
    et = xs.shape[0]
    k = et // tn
    hdo = out_ref.shape[1]
    h = ad_ref.shape[1]

    # One packed pair of MXU matmuls produces both the per-edge message (first HDo
    # lanes) and the src+edge attention-score contribution (last H lanes).
    tmp = (jnp.dot(xs, p1_ref[...], preferred_element_type=jnp.float32)
           + jnp.dot(ef, p2_ref[...], preferred_element_type=jnp.float32))    # [Et, HDo+H]
    m = tmp[:, :hdo]                                                           # [Et, HDo]
    s_se = tmp[:, hdo:]                                                        # [Et, H]

    # Destination-side score contribution (tiny matmul on the Tn rows only).
    s_dst = jnp.dot(xd, ad_ref[...], preferred_element_type=jnp.float32)       # [Tn, H]

    score = s_se.reshape(tn, k, h) + s_dst.reshape(tn, 1, h)                   # [Tn,K,H]
    score = jnp.where(score >= 0.0, score, 0.01 * score)                       # leaky_relu

    # Per-destination softmax over the K incoming edges (per-group max, safe).
    gmax = jnp.max(score, axis=1, keepdims=True)                               # [Tn,1,H]
    p = jnp.exp(score - gmax)                                                  # [Tn,K,H]
    denom = jnp.sum(p, axis=1, keepdims=True)                                  # [Tn,1,H]
    alpha = p * pl.reciprocal(denom, approx=True)                              # [Tn,K,H]

    # Expand per-head alpha across that head's Do output lanes (MXU), weight, and
    # segment-sum over the K edges of each destination (reshape + sublane reduce).
    alpha_w = jnp.dot(alpha.reshape(et, h), hmap_ref[...],
                      preferred_element_type=jnp.float32)                      # [Et, HDo]
    out = jnp.sum((alpha_w * m).reshape(tn, k, hdo), axis=1)                   # [Tn, HDo]
    out_ref[...] = out.astype(out_ref.dtype)


def _choose_tile_n(N, K, Dn, De_in, HDo, budget_bytes=6 << 20, max_tile=1024):
    """Largest sublane-aligned divisor of N whose pipelined tiles fit the budget."""
    # Double-buffered per-node bytes: src/edge rows (bf16), dst row (bf16), out row (f32).
    per_node = 2 * (K * (Dn + De_in) * 2 + Dn * 2 + HDo * 4)
    cap = min(N, max_tile, max(8, budget_bytes // max(per_node, 1)))
    best = None
    t = 8
    while t <= cap:
        if N % t == 0:
            best = t
        t += 8
    return best if best is not None else N   # block == full dim is always legal


def multi_head_gat(node_x, edge_x, neigh, wn, we, a, w2, *, tile_n=None):
    """Multi-head GAT forward (merge='cat').

    node_x [N,Dn] f32, edge_x [E,De_in] f32, neigh [N,K] int32,
    wn [H,Dn,Do], we [H,De_in,De], a [H, Do+De+Do, 1], w2 [H, Do+De, Do]
    (all weights stored as [in, out], i.e. transpose of torch Linear.weight).
    Returns [N, H*Do] f32.
    """
    N, Dn = node_x.shape
    E, De_in = edge_x.shape
    H, _, Do = wn.shape
    De = we.shape[-1]
    K = E // N
    assert E == N * K and neigh.shape == (N, K)
    HDo = H * Do

    if tile_n is None:
        tile_n = _choose_tile_n(N, K, Dn, De_in, HDo)
    tile_n = min(tile_n, N)
    assert N % tile_n == 0, "N must be divisible by tile_n"
    assert tile_n % 8 == 0 or tile_n == N, "node tile must be sublane-aligned"
    et = tile_n * K
    assert et % 8 == 0 or et == E, "edge tile must be sublane-aligned"

    # --- host-side parameter folding (pure linear algebra, done once) ---
    a1 = a[:, :Do, 0]                      # [H, Do]  src-z part of attn_fc
    a2 = a[:, Do:Do + De, 0]               # [H, De]  edge-ft part
    a3 = a[:, Do + De:, 0]                 # [H, Do]  dst-z part
    w2a = w2[:, :Do, :]                    # [H, Do, Do]  fc2, src-z block
    w2b = w2[:, Do:, :]                    # [H, De, Do]  fc2, edge-ft block

    p1 = jnp.einsum('hij,hjk->ihk', wn, w2a).reshape(Dn, HDo)      # fc_n @ fc2a
    p2 = jnp.einsum('hij,hjk->ihk', we, w2b).reshape(De_in, HDo)   # fc_e @ fc2b
    a_src = jnp.einsum('hij,hj->ih', wn, a1)                       # [Dn, H]
    a_dst = jnp.einsum('hij,hj->ih', wn, a3)                       # [Dn, H]
    a_edge = jnp.einsum('hij,hj->ih', we, a2)                      # [De_in, H]
    # Pack message + score columns so the big E-row operands hit the MXU once each.
    p1_ext = jnp.concatenate([p1, a_src], axis=1)                  # [Dn,    HDo+H]
    p2_ext = jnp.concatenate([p2, a_edge], axis=1)                 # [De_in, HDo+H]
    hmap = jnp.kron(jnp.eye(H, dtype=jnp.float32),
                    jnp.ones((1, Do), jnp.float32))                # [H, HDo]

    # Host-side gather of source-node rows per edge (keeps e = v*K + k order).
    # TODO(synk): for very large graphs, replace with in-kernel DMA gather of z rows.
    x_src = jnp.take(node_x, neigh.reshape(-1).astype(jnp.int32), axis=0)   # [E, Dn]

    bf = jnp.bfloat16
    xd = node_x.astype(bf)
    xs = x_src.astype(bf)
    ef = edge_x.astype(bf)
    p1_ext = p1_ext.astype(bf)
    p2_ext = p2_ext.astype(bf)
    a_dst = a_dst.astype(bf)

    grid = (N // tile_n,)
    out = pl.pallas_call(
        gat_fused_kernel,
        out_shape=jax.ShapeDtypeStruct((N, HDo), jnp.float32),
        grid_spec=pltpu.PrefetchScalarGridSpec(
            num_scalar_prefetch=0,
            grid=grid,
            in_specs=[
                pl.BlockSpec((tile_n, Dn), lambda t: (t, 0)),        # x (dst nodes)
                pl.BlockSpec((et, Dn), lambda t: (t, 0)),            # x_src per edge
                pl.BlockSpec((et, De_in), lambda t: (t, 0)),         # edge features
                pl.BlockSpec((Dn, HDo + H), lambda t: (0, 0)),       # packed p1 | a_src
                pl.BlockSpec((De_in, HDo + H), lambda t: (0, 0)),    # packed p2 | a_edge
                pl.BlockSpec((Dn, H), lambda t: (0, 0)),             # a_dst
                pl.BlockSpec((H, HDo), lambda t: (0, 0)),            # head expand map
            ],
            out_specs=pl.BlockSpec((tile_n, HDo), lambda t: (t, 0)),
        ),
        compiler_params=pltpu.CompilerParams(
            dimension_semantics=("parallel",)),
    )(xd, xs, ef, p1_ext, p2_ext, a_dst, hmap)
    return out


def ref_head(x, ef, neigh, wn, we, a_vec, w2):
    """Pure-JAX reference mirroring the PyTorch/DGL semantics for one head (f32)."""
    z = x @ wn
    eft = ef @ we
    N, K = neigh.shape
    src = neigh.reshape(-1)
    dst = jnp.repeat(jnp.arange(N), K)
    z_src = z[src]
    z_dst = z[dst]
    z2 = jnp.concatenate([z_src, eft, z_dst], axis=1)
    e = z2 @ a_vec                                   # [E, 1]
    e = jnp.where(e >= 0.0, e, 0.01 * e)             # leaky_relu
    alpha = jax.nn.softmax(e.reshape(N, K, 1), axis=1)
    zne = jnp.concatenate([z_src, eft], axis=1).reshape(N, K, -1)
    h = jnp.sum(alpha * zne, axis=1)
    return h @ w2


if __name__ == "__main__":
    # Small deterministic problem: N nodes, fixed in-degree K, 2 heads.
    N, K = 16, 4
    node_dim, edge_dim = 32, 16
    edge_ft_out_dim, out_dim = 16, 32
    num_heads = 2
    E = N * K
    Dcat = out_dim + edge_ft_out_dim
    Dtot = Dcat + out_dim

    key = jax.random.PRNGKey(0)
    ks = jax.random.split(key, 8)
    node_x = jax.random.normal(ks[0], (N, node_dim), jnp.float32)
    edge_x = jax.random.normal(ks[1], (E, edge_dim), jnp.float32)
    # neigh[v, k] = source node of the k-th incoming edge of node v (ring-ish graph)
    neigh = ((jnp.arange(N)[:, None] + jnp.arange(1, K + 1)[None, :]) % N).astype(jnp.int32)

    def init(k, shape, fan_in):
        bound = 1.0 / float(np.sqrt(fan_in))
        return jax.random.uniform(k, shape, jnp.float32, -bound, bound)

    # Per-head weights, stored as [in, out] (transpose of torch Linear.weight).
    wn = init(ks[2], (num_heads, node_dim, out_dim), node_dim)            # fc_n
    we = init(ks[3], (num_heads, edge_dim, edge_ft_out_dim), edge_dim)    # fc_e
    a = init(ks[4], (num_heads, Dtot, 1), Dtot)                           # attn_fc
    w2 = init(ks[5], (num_heads, Dcat, out_dim), Dcat)                    # fc2

    out = multi_head_gat(node_x, edge_x, neigh, wn, we, a, w2)
    out = jax.block_until_ready(out)

    # Pure-JAX f32 reference (merge='cat').
    ref = jnp.concatenate(
        [ref_head(node_x, edge_x, neigh, wn[h], we[h], a[h], w2[h])
         for h in range(num_heads)], axis=1)
    assert out.shape == (N, num_heads * out_dim)
    np.testing.assert_allclose(np.asarray(out), np.asarray(ref), rtol=5e-2, atol=5e-2)

    print("KERNEL_OK")
</pallas_src>

<mosaic_0001>
module attributes {stable_mosaic.version = 11 : i64} {
  func.func @gat_fused_kernel(%arg0: i32, %arg1: memref<16x32xbf16, #tpu.memory_space<vmem>>, %arg2: memref<64x32xbf16, #tpu.memory_space<vmem>>, %arg3: memref<64x16xbf16, #tpu.memory_space<vmem>>, %arg4: memref<32x66xbf16, #tpu.memory_space<vmem>>, %arg5: memref<16x66xbf16, #tpu.memory_space<vmem>>, %arg6: memref<32x2xbf16, #tpu.memory_space<vmem>>, %arg7: memref<2x64xf32, #tpu.memory_space<vmem>>, %arg8: memref<16x64xf32, #tpu.memory_space<vmem>>) attributes {dimension_semantics = [#tpu.dimension_semantics<parallel>], iteration_bounds = array<i64: 1>, scalar_prefetch = 0 : i64, scratch_operands = 0 : i64, tpu.core_type = #tpu.core_type<tc>, window_params = [{transform_indices = @transform_0, window_bounds = array<i64: 16, 32>}, {transform_indices = @transform_1, window_bounds = array<i64: 64, 32>}, {transform_indices = @transform_2, window_bounds = array<i64: 64, 16>}, {pipeline_mode = #tpu.pipeline_mode<synchronous>, transform_indices = @transform_3, window_bounds = array<i64: 32, 66>}, {pipeline_mode = #tpu.pipeline_mode<synchronous>, transform_indices = @transform_4, window_bounds = array<i64: 16, 66>}, {pipeline_mode = #tpu.pipeline_mode<synchronous>, transform_indices = @transform_5, window_bounds = array<i64: 32, 2>}, {pipeline_mode = #tpu.pipeline_mode<synchronous>, transform_indices = @transform_6, window_bounds = array<i64: 2, 64>}, {transform_indices = @transform_7, window_bounds = array<i64: 16, 64>}]} {
    %c0 = arith.constant 0 : index
    %c0_0 = arith.constant 0 : index
    %0 = vector.load %arg1[%c0, %c0_0] : memref<16x32xbf16, #tpu.memory_space<vmem>>, vector<16x32xbf16>
    %c0_1 = arith.constant 0 : index
    %c0_2 = arith.constant 0 : index
    %1 = vector.load %arg2[%c0_1, %c0_2] : memref<64x32xbf16, #tpu.memory_space<vmem>>, vector<64x32xbf16>
    %c0_3 = arith.constant 0 : index
    %c0_4 = arith.constant 0 : index
    %2 = vector.load %arg3[%c0_3, %c0_4] : memref<64x16xbf16, #tpu.memory_space<vmem>>, vector<64x16xbf16>
    %c0_5 = arith.constant 0 : index
    %c0_6 = arith.constant 0 : index
    %3 = vector.load %arg4[%c0_5, %c0_6] : memref<32x66xbf16, #tpu.memory_space<vmem>>, vector<32x66xbf16>
    %cst = arith.constant dense<0.000000e+00> : vector<64x66xf32>
    %4 = tpu.matmul %1, %3, %cst {dimension_numbers = #tpu.dot_dimension_numbers<[1], [0], [0], [1], [0, 0, 1, 1], [], []>} : vector<64x32xbf16>, vector<32x66xbf16>, vector<64x66xf32> -> vector<64x66xf32>
    %c0_7 = arith.constant 0 : index
    %c0_8 = arith.constant 0 : index
    %5 = vector.load %arg5[%c0_7, %c0_8] : memref<16x66xbf16, #tpu.memory_space<vmem>>, vector<16x66xbf16>
    %cst_9 = arith.constant dense<0.000000e+00> : vector<64x66xf32>
    %6 = tpu.matmul %2, %5, %cst_9 {dimension_numbers = #tpu.dot_dimension_numbers<[1], [0], [0], [1], [0, 0, 1, 1], [], []>} : vector<64x16xbf16>, vector<16x66xbf16>, vector<64x66xf32> -> vector<64x66xf32>
    %7 = arith.addf %4, %6 : vector<64x66xf32>
    %8 = vector.extract_strided_slice %7 {offsets = [0, 0], sizes = [64, 64], strides = [1, 1]} : vector<64x66xf32> to vector<64x64xf32>
    %9 = vector.extract_strided_slice %7 {offsets = [0, 64], sizes = [64, 2], strides = [1, 1]} : vector<64x66xf32> to vector<64x2xf32>
    %c0_10 = arith.constant 0 : index
    %c0_11 = arith.constant 0 : index
    %10 = vector.load %arg6[%c0_10, %c0_11] : memref<32x2xbf16, #tpu.memory_space<vmem>>, vector<32x2xbf16>
    %cst_12 = arith.constant dense<0.000000e+00> : vector<16x2xf32>
    %11 = tpu.matmul %0, %10, %cst_12 {dimension_numbers = #tpu.dot_dimension_numbers<[1], [0], [0], [1], [0, 0, 1, 1], [], []>} : vector<16x32xbf16>, vector<32x2xbf16>, vector<16x2xf32> -> vector<16x2xf32>
    %12 = vector.shape_cast %9 : vector<64x2xf32> to vector<16x4x2xf32>
    %13 = vector.shape_cast %11 : vector<16x2xf32> to vector<16x1x2xf32>
    %14 = vector.broadcast %13 : vector<16x1x2xf32> to vector<16x4x2xf32>
    %15 = arith.addf %12, %14 : vector<16x4x2xf32>
    %cst_13 = arith.constant 0.000000e+00 : f32
    %16 = vector.broadcast %cst_13 : f32 to vector<16x4x2xf32>
    %17 = arith.cmpf oge, %15, %16 : vector<16x4x2xf32>
    %cst_14 = arith.constant 0.00999999977 : f32
    %18 = vector.broadcast %cst_14 : f32 to vector<16x4x2xf32>
    %19 = arith.mulf %18, %15 : vector<16x4x2xf32>
    %20 = arith.select %17, %15, %19 : vector<16x4x2xi1>, vector<16x4x2xf32>
    %cst_15 = arith.constant dense<0xFF800000> : vector<16x2xf32>
    %21 = vector.multi_reduction <maximumf>, %20, %cst_15 [1] : vector<16x4x2xf32> to vector<16x2xf32>
    %22 = vector.shape_cast %21 : vector<16x2xf32> to vector<16x1x2xf32>
    %23 = vector.broadcast %22 : vector<16x1x2xf32> to vector<16x4x2xf32>
    %24 = arith.subf %20, %23 : vector<16x4x2xf32>
    %25 = math.exp %24 : vector<16x4x2xf32>
    %cst_16 = arith.constant dense<0.000000e+00> : vector<16x2xf32>
    %26 = vector.multi_reduction <add>, %25, %cst_16 [1] : vector<16x4x2xf32> to vector<16x2xf32>
    %27 = vector.shape_cast %26 : vector<16x2xf32> to vector<16x1x2xf32>
    %28 = tpu.reciprocal %27 {approx = true} : vector<16x1x2xf32> -> vector<16x1x2xf32>
    %29 = vector.broadcast %28 : vector<16x1x2xf32> to vector<16x4x2xf32>
    %30 = arith.mulf %25, %29 : vector<16x4x2xf32>
    %31 = vector.shape_cast %30 : vector<16x4x2xf32> to vector<64x2xf32>
    %c0_17 = arith.constant 0 : index
    %c0_18 = arith.constant 0 : index
    %32 = vector.load %arg7[%c0_17, %c0_18] : memref<2x64xf32, #tpu.memory_space<vmem>>, vector<2x64xf32>
    %cst_19 = arith.constant dense<0.000000e+00> : vector<64x64xf32>
    %33 = tpu.matmul %31, %32, %cst_19 {dimension_numbers = #tpu.dot_dimension_numbers<[1], [0], [0], [1], [0, 0, 1, 1], [], []>} : vector<64x2xf32>, vector<2x64xf32>, vector<64x64xf32> -> vector<64x64xf32>
    %34 = arith.mulf %33, %8 : vector<64x64xf32>
    %35 = vector.shape_cast %34 : vector<64x64xf32> to vector<16x4x64xf32>
    %cst_20 = arith.constant dense<0.000000e+00> : vector<16x64xf32>
    %36 = vector.multi_reduction <add>, %35, %cst_20 [1] : vector<16x4x64xf32> to vector<16x64xf32>
    %c0_21 = arith.constant 0 : index
    %c0_22 = arith.constant 0 : index
    %37 = vector.load %arg8[%c0_21, %c0_22] : memref<16x64xf32, #tpu.memory_space<vmem>>, vector<16x64xf32>
    tpu.vector_store %arg8[%c0_21, %c0_22], %36 {strides = array<i32>} : memref<16x64xf32, #tpu.memory_space<vmem>>, vector<16x64xf32>,
    return
  }
  func.func @transform_0(%arg0: i32) -> (i32, i32) {
    %c0_i32 = arith.constant 0 : i32
    %c0_i32_0 = arith.constant 0 : i32
    return %arg0, %c0_i32 : i32, i32
  }
  func.func @transform_1(%arg0: i32) -> (i32, i32) {
    %c0_i32 = arith.constant 0 : i32
    %c0_i32_0 = arith.constant 0 : i32
    return %arg0, %c0_i32 : i32, i32
  }
  func.func @transform_2(%arg0: i32) -> (i32, i32) {
    %c0_i32 = arith.constant 0 : i32
    %c0_i32_0 = arith.constant 0 : i32
    return %arg0, %c0_i32 : i32, i32
  }
  func.func @transform_3(%arg0: i32) -> (i32, i32) {
    %c0_i32 = arith.constant 0 : i32
    %c0_i32_0 = arith.constant 0 : i32
    %c0_i32_1 = arith.constant 0 : i32
    return %c0_i32, %c0_i32_0 : i32, i32
  }
  func.func @transform_4(%arg0: i32) -> (i32, i32) {
    %c0_i32 = arith.constant 0 : i32
    %c0_i32_0 = arith.constant 0 : i32
    %c0_i32_1 = arith.constant 0 : i32
    return %c0_i32, %c0_i32_0 : i32, i32
  }
  func.func @transform_5(%arg0: i32) -> (i32, i32) {
    %c0_i32 = arith.constant 0 : i32
    %c0_i32_0 = arith.constant 0 : i32
    %c0_i32_1 = arith.constant 0 : i32
    return %c0_i32, %c0_i32_0 : i32, i32
  }
  func.func @transform_6(%arg0: i32) -> (i32, i32) {
    %c0_i32 = arith.constant 0 : i32
    %c0_i32_0 = arith.constant 0 : i32
    %c0_i32_1 = arith.constant 0 : i32
    return %c0_i32, %c0_i32_0 : i32, i32
  }
  func.func @transform_7(%arg0: i32) -> (i32, i32) {
    %c0_i32 = arith.constant 0 : i32
    %c0_i32_0 = arith.constant 0 : i32
    return %arg0, %c0_i32 : i32, i32
  }
}

</mosaic_0001>

<bundles_post_ra>
// kernel: tpu_custom_call.1
= control target key start
LH: loop header
LB: loop body
LE: loop exit
PB: predicated region body
PF: predicated region fallthrough
CT: control target
= control target key end

     0   :  { %vm78_vm0 = vcmask 130048   ;;  %vm188_vm1 = vcmask 261120   ;;  %v1516_v10 = vmov 0.0   ;;  %s1966_s0 = inlined_call_operand.vmem [shape: bf16[16,32], index: 0, kind: input, shape index: {}]   ;;  %s1967_s1 = inlined_call_operand.vmem [shape: bf16[64,32], index: 1, kind: input, shape index: {}]   ;;  %s1968_s2 = inlined_call_operand.vmem [shape: bf16[64,16], index: 2, kind: input, shape index: {}]   ;;  %s1969_s3 = inlined_call_operand.vmem [shape: bf16[32,66], index: 3, kind: input, shape index: {}]   ;;  %s1970_s4 = inlined_call_operand.vmem [shape: bf16[16,66], index: 4, kind: input, shape index: {}]   ;;  %s1971_s5 = inlined_call_operand.vmem [shape: bf16[32,2], index: 5, kind: input, shape index: {}]   ;;  %s1972_s6 = inlined_call_operand.vmem [shape: f32[2,64], index: 6, kind: input, shape index: {}]   ;;  %s1973_s7 = inlined_call_operand.hbm [shape: f32[16,64], index: 7, kind: output, shape index: {}]  }
   0x1   :  { %v1416_v0 = vld [vmem:[%s1970_s4] sm:$0xff]   ;;  %v1418_v2 = vld [vmem:[%s1968_s2 + $0x8] sm:$0xff]   ;;  %v1421_v5 = vld [vmem:[%s1968_s2 + $0x10] sm:$0xff]  }
   0x2   :  { %v1417_v1 = vld [vmem:[%s1968_s2] sm:$0xff]   ;;  %1361 = vmatprep.subr.bf16.mxu0 %v1416_v0  ;;  %v1419_v3 = vld [vmem:[%s1969_s3 + $0x8] sm:$0xff]   ;;  %v1422_v6 = vld [vmem:[%s1967_s1 + $0x10] sm:$0xff]  }
   0x3   :  { %1362 = vmatpush3.bf16.msra.mxu0 %v1416_v0  ;;  %1363 = vmatprep.mubr.msk.bf16.mxu0 %vm78_vm0, %v1417_v1  ;;  %v1420_v4 = vld [vmem:[%s1969_s3] sm:$0xff]   ;;  %v1424_v7 = vld [vmem:[%s1967_s1 + $0x18] sm:$0xff]  }
   0x4   :  { %1371 = vmatprep.subr.bf16.mxu0 %v1419_v3  ;;  %1405 = vmatprep.subr.bf16.mxu1 %v1419_v3  ;;  %v1423_v8 = vld [vmem:[%s1968_s2 + $0x18] sm:$0xff]   ;;  %v1425_v9 = vld [vmem:[%s1967_s1] sm:$0xff]  }
   0x5   :  { %1407 = vmatpush3.bf16.msra.mxu1 %v1419_v3  ;;  %1379 = vmatprep.mubr.msk.bf16.mxu1 %vm188_vm1, %v1422_v6 }
   0x6   :  { %1364 = vmatmul.mubr.msk.bf16.vlgmr.msra.gmra.mxu0 %vm78_vm0, %v1418_v2  ;;  %1406 = vmatprep.subr.bf16.mxu1 %v1420_v4 }
   0x7   :  { %1372 = vmatpush3.bf16.msra.mxu0 %v1419_v3  ;;  %1367 = vmatprep.mubr.msk.bf16.mxu0 %vm78_vm0, %v1421_v5 }
   0x8   :  { %1373 = vmatprep.subr.bf16.mxu0 %v1420_v4 }
   0x9   :  { %1408 = vmatpush3.bf16.msra.mxu1 %v1420_v4 }
   0xb   :  { %1374 = vmatpush3.bf16.msra.mxu0 %v1420_v4 }
   0xc   :  { %1383 = vmatprep.subr.bf16.mxu0 %v1516_v10  ;;  %1380 = vmatmul.mubr.msk.bf16.vlgmr.msra.gmra.mxu1 %vm188_vm1, %v1424_v7 }
   0xe   :  { %1368 = vmatmul.mubr.msk.bf16.gmra.mxu0 %vm78_vm0, %v1423_v8 }
   0xf   :  { %12 = vsyncpa [#allocation3], 0  ;;  %1375 = vmatprep.mubr.msk.bf16.mxu0 %vm188_vm1, %v1425_v9  ;;  %v1426_v11 = vld [vmem:[%s1967_s1 + $0x8] sm:$0xff]   ;;  %v1428_v13 = vld [vmem:[%s1971_s5] sm:$0xff]   ;;  %vm1517_vm2 = vmmov 0   ;;  %v361_v24 = vlaneseq  ;;  %vm631_vm3 = vcmask 536064  }
  0x10   :  { %v1427_v12 = vld [vmem:[%s1971_s5 + $0x8] sm:$0xff]   ;;  %v1429_v14 = vld [vmem:[%s1966_s0] sm:$0xff]   ;;  %v1518_v22 = vmov 1966171168   ;;  %s1519_s0 = smov 64  }
  0x11   :  { %v359_v23 = vunpack.c.l.s4 %v1518_v22  ;;  %v362_v29 = vshrl.u32 %v361_v24, 7 }
  0x13   :  { %v360_v28 = vunpack.c.0.s8 %v359_v23  ;;  %v457_v40 = vsub.s32 0, %v362_v29 }
  0x15   :  { %v363_v34 = vsub.s32 %v360_v28, %v362_v29 }
  0x16   :  { %1376 = vmatmul.mubr.msk.bf16.vlgmr.msra.gmra.mxu0 %vm188_vm1, %v1426_v11 }
  0x17   :  { %1384 = vmatpush3.bf16.msra.mxu0 %v1427_v12  ;;  %1387 = vmatprep.mubr.msk.bf16.mxu0 %vm1517_vm2, %v1516_v10 }
  0x18   :  { %1385 = vmatprep.subr.bf16.mxu0 %v1516_v10 }
  0x1b   :  { %1386 = vmatpush3.bf16.msra.mxu0 %v1428_v13 }
  0x1e   :  { %1388 = vmatmul.mubr.msk.bf16.vlgmr.msra.gmra.mxu0 %vm188_vm1, %v1429_v14 }
  0xc6   :  { %v1365_v15 = vpop.f32.mrf.mxu0 }
  0xc8   :  { %v125_v16 = vpop.f32.mrf.mxu0 }
  0xca   :  { %v1366_v17 = vpop.f32.mrf.mxu0 }
  0xcc   :  { %v128_v18 = vpop.f32.mrf.mxu0  ;;  %v1381_v23 = vpop.f32.mrf.mxu1 }
  0xce   :  { %v1614_v19 = vpop.f32.mrf.mxu0  ;;  %v251_v24 = vpop.f32.mrf.mxu1 }
  0xd0   :  { %v1616_v20 = vpop.f32.mrf.mxu0 }
  0xd2   :  { %v1618_v21 = vpop.f32.mrf.mxu0 }
  0xd4   :  { %v1620_v25 = vpop.f32.mrf.mxu0 }
  0xd6   :  { %v1377_v26 = vpop.f32.mrf.mxu0 }
  0xd7   :  { %v1622_v27 = vadd.f32 %v1377_v26, %v1365_v15  ;;  %v1382_v26 = vpop.f32.mrf.mxu1 }
  0xd8   :  { %v235_v30 = vpop.f32.mrf.mxu0 }
  0xd9   :  { %v1624_v31 = vadd.f32 %v235_v30, %v125_v16  ;;  %v254_v29 = vpop.f32.mrf.mxu1 }
  0xda   :  { %v1378_v32 = vpop.f32.mrf.mxu0 }
  0xdb   :  { %v1626_v33 = vadd.f32 %v1378_v32, %v1366_v17  ;;  %v1648_v32 = vadd.f32 %v1381_v23, %v1614_v19 }
  0xdc   :  { %v238_v35 = vpop.f32.mrf.mxu0 }
  0xdd   :  { %v1628_v36 = vadd.f32 %v238_v35, %v128_v18 }
  0xde   :  { %v324_v37 = vpop.f32.mrf.mxu0 }
  0xdf   :  { %v357_v38 = vcombine.high %v324_v37, %v324_v37  ;;  %v364_v39 = vrot.slane %v324_v37, %v363_v34 }
  0xe0   :  { %v1389_v41 = vpop.f32.mrf.mxu0 }
  0xe1   :  { %v372_v42 = vcombine.high %v364_v39, %v364_v39  ;;  %v380_v43 = vrot.slane %v364_v39, %v363_v34  ;;  %v371_v44 = vrot.slane %v357_v38, %v363_v34  ;;  %v339_v39 = vcombine.high %v1624_v31, %v1624_v31 }
  0xe2   :  { %v327_v45 = vpop.f32.mrf.mxu0  ;;  %v1660_v41 = vadd.f32 %v254_v29, %v1620_v25  ;;  %v345_v25 = vcombine.high %v1648_v32, %v1648_v32 }
  0xe3   :  { %v394_v46 = vrot.slane %v372_v42, %v363_v34  ;;  %v458_v48 = vrot.slane %v380_v43, %v457_v40  ;;  %v402_v49 = vcombine.high %v380_v43, %v380_v43  ;;  %v373_v50 = vcombine.high %v371_v44, %v371_v44 }
  0xe4   :  { %v1390_v47 = vpop.f32.mrf.mxu0  ;;  %v387_v53 = vrot.slane %v371_v44, %v363_v34  ;;  %v413_v55 = vrot.slane %v327_v45, %v363_v34  ;;  %v406_v60 = vcombine.high %v327_v45, %v327_v45  ;;  %v340_v45 = vcombine.high %v1628_v36, %v1628_v36 }
  0xe5   :  { %519 = vrot.lane.b32.xlu0 %v458_v48, %s1519_s0  ;;  %v466_v51 = vrot.slane %v402_v49, %v457_v40  ;;  %v404_v52 = vcombine.high %v394_v46, %v394_v46  ;;  %v462_v54 = vrot.slane %v394_v46, %v457_v40  ;;  %v401_v57 = vrot.slane %v373_v50, %v363_v34 }
  0xe6   :  { %v474_v58 = vrot.slane %v387_v53, %v457_v40  ;;  %v403_v59 = vcombine.high %v387_v53, %v387_v53  ;;  %v421_v61 = vcombine.high %v413_v55, %v413_v55  ;;  %v429_v0 = vrot.slane %v413_v55, %v363_v34 }
  0xe7   :  { %523 = vrot.lane.b32.xlu1 %v466_v51, %s1519_s0  ;;  %v470_v56 = vrot.slane %v404_v52, %v457_v40  ;;  %v478_v62 = vrot.slane %v401_v57, %v457_v40  ;;  %v405_v63 = vcombine.high %v401_v57, %v401_v57  ;;  %v420_v2 = vrot.slane %v406_v60, %v363_v34 }
  0xe8   :  { %v482_v1 = vrot.slane %v403_v59, %v457_v40  ;;  %v443_v3 = vrot.slane %v421_v61, %v363_v34  ;;  %v451_v5 = vcombine.high %v429_v0, %v429_v0  ;;  %v490_v6 = vrot.slane %v429_v0, %v457_v40 }
  0xe9   :  { %521 = vrot.lane.b32.xlu0 %v462_v54, %s1519_s0  ;;  %v486_v4 = vrot.slane %v405_v63, %v457_v40  ;;  %v422_v7 = vcombine.high %v420_v2, %v420_v2  ;;  %v436_v10 = vrot.slane %v420_v2, %v363_v34  ;;  %v344_v53 = vcombine.high %v1660_v41, %v1660_v41 }
  0xea   :  { %v494_v8 = vrot.slane %v443_v3, %v457_v40  ;;  %v453_v9 = vcombine.high %v443_v3, %v443_v3  ;;  %v498_v11 = vrot.slane %v451_v5, %v457_v40  ;;  %v341_v61 = vcombine.high %v1622_v27, %v1622_v27 }
  0xeb   :  { %525 = vrot.lane.b32.xlu1 %v470_v56, %s1519_s0  ;;  %v450_v13 = vrot.slane %v422_v7, %v363_v34  ;;  %v506_v14 = vrot.slane %v436_v10, %v457_v40  ;;  %v452_v15 = vcombine.high %v436_v10, %v436_v10  ;;  %v1651_v34 = vadd.f32 %v251_v24, %v1616_v20 }
  0xec   :  { %v502_v12 = vrot.slane %v453_v9, %v457_v40  ;;  %v342_v5 = vcombine.high %v1626_v33, %v1626_v33 }
  0xed   :  { %527 = vrot.lane.b32.xlu0 %v474_v58, %s1519_s0  ;;  %v510_v16 = vrot.slane %v450_v13, %v457_v40  ;;  %v454_v17 = vcombine.high %v450_v13, %v450_v13  ;;  %v514_v18 = vrot.slane %v452_v15, %v457_v40 }
  0xef   :  { %529 = vrot.lane.b32.xlu1 %v478_v62, %s1519_s0  ;;  %v518_v22 = vrot.slane %v454_v17, %v457_v40  ;;  %v1657_v40 = vadd.f32 %v1382_v26, %v1618_v21  ;;  %v343_v21 = vcombine.high %v1651_v34, %v1651_v34 }
  0xf1   :  { %531 = vrot.lane.b32.xlu0 %v482_v1, %s1519_s0  ;;  %v346_v54 = vcombine.high %v1657_v40, %v1657_v40 }
  0xf3   :  { %533 = vrot.lane.b32.xlu1 %v486_v4, %s1519_s0 }
  0xf5   :  { %535 = vrot.lane.b32.xlu0 %v490_v6, %s1519_s0 }
  0xf7   :  { %537 = vrot.lane.b32.xlu1 %v494_v8, %s1519_s0 }
  0xf9   :  { %539 = vrot.lane.b32.xlu0 %v498_v11, %s1519_s0 }
  0xfb   :  { %541 = vrot.lane.b32.xlu1 %v502_v12, %s1519_s0 }
  0xfd   :  { %543 = vrot.lane.b32.xlu0 %v506_v14, %s1519_s0 }
  0xff   :  { %545 = vrot.lane.b32.xlu1 %v510_v16, %s1519_s0 }
 0x101   :  { %547 = vrot.lane.b32.xlu0 %v514_v18, %s1519_s0 }
 0x103   :  { %549 = vrot.lane.b32.xlu1 %v518_v22, %s1519_s0 }
 0x157   :  { %v520_v28 = vpop.permute.xlu0 %519 }
 0x158   :  { %v567_v30 = vadd.f32 %v520_v28, %v1624_v31 }
 0x159   :  { %v524_v35 = vpop.permute.xlu1 %523 }
 0x15a   :  { %vm583_vm4 = vcmp.ge.f32.partialorder %v567_v30, 0.0  ;;  %v599_v37 = vmul.f32 0.01, %v567_v30  ;;  %v569_v38 = vadd.f32 %v524_v35, %v1628_v36 }
 0x15b   :  { %v522_v19 = vpop.permute.xlu0 %521 }
 0x15c   :  { %v1662_v42 = vsel %vm583_vm4, %v567_v30, %v599_v37  ;;  %vm585_vm5 = vcmp.ge.f32.partialorder %v569_v38, 0.0  ;;  %v601_v20 = vmul.f32 0.01, %v569_v38  ;;  %v568_v43 = vadd.f32 %v522_v19, %v339_v39 }
 0x15d   :  { %v632_v44 = vsel %vm631_vm3, %v1662_v42, -inf  ;;  %v526_v46 = vpop.permute.xlu1 %525 }
 0x15e   :  { %v633_v47 = vrot.slane %v632_v44, 4  ;;  %v1672_v48 = vsel %vm585_vm5, %v569_v38, %v601_v20  ;;  %vm584_vm6 = vcmp.ge.f32.partialorder %v568_v43, 0.0  ;;  %v600_v49 = vmul.f32 0.01, %v568_v43 }
 0x15f   :  { %v646_v50 = vsel %vm631_vm3, %v1672_v48, -inf  ;;  %v570_v51 = vadd.f32 %v526_v46, %v340_v45  ;;  %v528_v52 = vpop.permute.xlu0 %527  ;;  %vm994_vm5 = vcmask 1041408  }
 0x160   :  { %v634_v55 = vmax.f32 %v632_v44, %v633_v47  ;;  %v647_v56 = vrot.slane %v646_v50, 4  ;;  %v1680_v57 = vsel %vm584_vm6, %v568_v43, %v600_v49  ;;  %v571_v58 = vadd.f32 %v528_v52, %v1622_v27 }
 0x161   :  { %v639_v59 = vsel %vm631_vm3, %v1680_v57, -inf  ;;  %vm586_vm7 = vcmp.ge.f32.partialorder %v570_v51, 0.0  ;;  %v602_v60 = vmul.f32 0.01, %v570_v51  ;;  %v530_v62 = vpop.permute.xlu1 %529  ;;  %vm1135_vm6 = vcmask 519168  }
 0x162   :  { %v635_v63 = vrot.slane %v634_v55, 2  ;;  %v648_v0 = vmax.f32 %v646_v50, %v647_v56  ;;  %v640_v1 = vrot.slane %v639_v59, 4  ;;  %vm587_vm8 = vcmp.ge.f32.partialorder %v571_v58, 0.0 }
 0x163   :  { %v1687_v2 = vsel %vm586_vm7, %v570_v51, %v602_v60  ;;  %v603_v3 = vmul.f32 0.01, %v571_v58  ;;  %v572_v4 = vadd.f32 %v530_v62, %v341_v61  ;;  %v532_v10 = vpop.permute.xlu0 %531  ;;  %vm1264_vm7 = vcmask 1041409  }
 0x164   :  { %v636_v6 = vmax.f32 %v634_v55, %v635_v63  ;;  %v649_v7 = vrot.slane %v648_v0, 2  ;;  %v641_v8 = vmax.f32 %v639_v59, %v640_v1  ;;  %v653_v9 = vsel %vm631_vm3, %v1687_v2, -inf }
 0x165   :  { %v654_v11 = vrot.slane %v653_v9, 4  ;;  %v1693_v12 = vsel %vm587_vm8, %v571_v58, %v603_v3  ;;  %vm588_vm9 = vcmp.ge.f32.partialorder %v572_v4, 0.0  ;;  %v604_v13 = vmul.f32 0.01, %v572_v4  ;;  %v534_v18 = vpop.permute.xlu1 %533 }
 0x166   :  { %v637_v14 = vrot.slane %v636_v6, 1  ;;  %v650_v15 = vmax.f32 %v648_v0, %v649_v7  ;;  %v642_v16 = vrot.slane %v641_v8, 2  ;;  %v660_v17 = vsel %vm631_vm3, %v1693_v12, -inf }
 0x167   :  { %v655_v22 = vmax.f32 %v653_v9, %v654_v11  ;;  %v661_v23 = vrot.slane %v660_v17, 4  ;;  %v1697_v24 = vsel %vm588_vm9, %v572_v4, %v604_v13  ;;  %v573_v26 = vadd.f32 %v532_v10, %v1626_v33  ;;  %v536_v56 = vpop.permute.xlu0 %535 }
 0x168   :  { %v638_v28 = vmax.f32 %v636_v6, %v637_v14  ;;  %v651_v29 = vrot.slane %v650_v15, 1  ;;  %v643_v30 = vmax.f32 %v641_v8, %v642_v16  ;;  %v667_v35 = vsel %vm631_vm3, %v1697_v24, -inf }
 0x169   :  { %v656_v37 = vrot.slane %v655_v22, 2  ;;  %v662_v38 = vmax.f32 %v660_v17, %v661_v23  ;;  %v668_v39 = vrot.slane %v667_v35, 4  ;;  %vm589_vm10 = vcmp.ge.f32.partialorder %v573_v26, 0.0  ;;  %v538_v58 = vpop.permute.xlu1 %537 }
 0x16a   :  { %v744_v19 = vsub.f32 %v1662_v42, %v638_v28  ;;  %v652_v20 = vmax.f32 %v650_v15, %v651_v29  ;;  %v644_v43 = vrot.slane %v643_v30, 1  ;;  %v605_v44 = vmul.f32 0.01, %v573_v26 }
 0x16b   :  { %v657_v45 = vmax.f32 %v655_v22, %v656_v37  ;;  %v663_v46 = vrot.slane %v662_v38, 2  ;;  %v669_v47 = vmax.f32 %v667_v35, %v668_v39  ;;  %v574_v49 = vadd.f32 %v534_v18, %v342_v5  ;;  %v540_v14 = vpop.permute.xlu0 %539 }
 0x16c   :  { %v760_v50 = vmul.f32 1.442695, %v744_v19  ;;  %v746_v51 = vsub.f32 %v1672_v48, %v652_v20  ;;  %v645_v52 = vmax.f32 %v643_v30, %v644_v43  ;;  %v1704_v55 = vsel %vm589_vm10, %v573_v26, %v605_v44 }
 0x16d   :  { %v658_v59 = vrot.slane %v657_v45, 1  ;;  %v664_v60 = vmax.f32 %v662_v38, %v663_v46  ;;  %v670_v61 = vrot.slane %v669_v47, 2  ;;  %v674_v42 = vsel %vm631_vm3, %v1704_v55, -inf  ;;  %v542_v15 = vpop.permute.xlu1 %541 }
 0x16e   :  { %1430 = vpow2.f32 %v760_v50  ;;  %v764_v62 = vmul.f32 1.442695, %v746_v51  ;;  %v745_v63 = vsub.f32 %v1680_v57, %v645_v52  ;;  %v675_v0 = vrot.slane %v674_v42, 4 }
 0x16f   :  { %v659_v1 = vmax.f32 %v657_v45, %v658_v59  ;;  %v665_v3 = vrot.slane %v664_v60, 1  ;;  %v671_v4 = vmax.f32 %v669_v47, %v670_v61  ;;  %vm590_vm11 = vcmp.ge.f32.partialorder %v574_v49, 0.0  ;;  %v544_v45 = vpop.permute.xlu0 %543 }
 0x170   :  { %1432 = vpow2.f32 %v764_v62  ;;  %v762_v48 = vmul.f32 1.442695, %v745_v63  ;;  %v676_v5 = vmax.f32 %v674_v42, %v675_v0  ;;  %v606_v6 = vmul.f32 0.01, %v574_v49 }
 0x171   :  { %v747_v7 = vsub.f32 %v1687_v2, %v659_v1  ;;  %v666_v8 = vmax.f32 %v664_v60, %v665_v3  ;;  %v672_v9 = vrot.slane %v671_v4, 1  ;;  %v575_v10 = vadd.f32 %v536_v56, %v1651_v34 }
 0x172   :  { %1434 = vpow2.f32 %v762_v48  ;;  %v677_v11 = vrot.slane %v676_v5, 2  ;;  %v1711_v13 = vsel %vm590_vm11, %v574_v49, %v606_v6  ;;  %v576_v57 = vadd.f32 %v538_v58, %v343_v21 }
 0x173   :  { %v766_v16 = vmul.f32 1.442695, %v747_v7  ;;  %v748_v17 = vsub.f32 %v1693_v12, %v666_v8  ;;  %v673_v18 = vmax.f32 %v671_v4, %v672_v9  ;;  %v681_v2 = vsel %vm631_vm3, %v1711_v13, -inf }
 0x174   :  { %v678_v22 = vmax.f32 %v676_v5, %v677_v11  ;;  %v682_v23 = vrot.slane %v681_v2, 4  ;;  %vm591_vm12 = vcmp.ge.f32.partialorder %v575_v10, 0.0  ;;  %v607_v26 = vmul.f32 0.01, %v575_v10 }
 0x175   :  { %1436 = vpow2.f32 %v766_v16  ;;  %v768_v28 = vmul.f32 1.442695, %v748_v17  ;;  %v749_v29 = vsub.f32 %v1697_v24, %v673_v18  ;;  %vm592_vm13 = vcmp.ge.f32.partialorder %v576_v57, 0.0  ;;  %v546_v24 = vpop.permute.xlu1 %545 }
 0x176   :  { %v679_v30 = vrot.slane %v678_v22, 1  ;;  %v683_v21 = vmax.f32 %v681_v2, %v682_v23  ;;  %v1720_v35 = vsel %vm591_vm12, %v575_v10, %v607_v26  ;;  %v608_v37 = vmul.f32 0.01, %v576_v57 }
 0x177   :  { %1438 = vpow2.f32 %v768_v28  ;;  %v770_v12 = vmul.f32 1.442695, %v749_v29  ;;  %v688_v38 = vsel %vm631_vm3, %v1720_v35, -inf  ;;  %v577_v39 = vadd.f32 %v540_v14, %v1660_v41 }
 0x178   :  { %v680_v19 = vmax.f32 %v678_v22, %v679_v30  ;;  %v684_v20 = vrot.slane %v683_v21, 2  ;;  %v689_v43 = vrot.slane %v688_v38, 4  ;;  %v1725_v44 = vsel %vm592_vm13, %v576_v57, %v608_v37 }
 0x179   :  { %1440 = vpow2.f32 %v770_v12  ;;  %v695_v46 = vsel %vm631_vm3, %v1725_v44, -inf  ;;  %vm593_vm14 = vcmp.ge.f32.partialorder %v577_v39, 0.0  ;;  %v609_v47 = vmul.f32 0.01, %v577_v39 }
 0x17a   :  { %v750_v49 = vsub.f32 %v1704_v55, %v680_v19  ;;  %v685_v50 = vmax.f32 %v683_v21, %v684_v20  ;;  %v690_v51 = vmax.f32 %v688_v38, %v689_v43  ;;  %v696_v52 = vrot.slane %v695_v46, 4 }
 0x17b   :  { %v1730_v56 = vpop.eup %1430  ;;  %v1732_v58 = vsel %vm593_vm14, %v577_v39, %v609_v47  ;;  %v578_v59 = vadd.f32 %v542_v15, %v344_v53  ;;  %v1738_v60 = vadd.f32 %v544_v45, %v1648_v32  ;;  %v1743_v61 = vadd.f32 %v546_v24, %v345_v25 }
 0x17c   :  { %v792_v55 = vsel %vm631_vm3, %v1730_v56, 0.0  ;;  %v772_v42 = vmul.f32 1.442695, %v750_v49  ;;  %v686_v62 = vrot.slane %v685_v50, 1  ;;  %v691_v63 = vrot.slane %v690_v51, 2 }
 0x17d   :  { %v1747_v0 = vpop.eup %1432  ;;  %v793_v1 = vrot.slane %v792_v55, 4  ;;  %v697_v3 = vmax.f32 %v695_v46, %v696_v52  ;;  %v702_v53 = vsel %vm631_vm3, %v1732_v58, -inf  ;;  %vm594_vm15 = vcmp.ge.f32.partialorder %v578_v59, 0.0 }
 0x17e   :  { %v806_v4 = vsel %vm631_vm3, %v1747_v0, 0.0  ;;  %1442 = vpow2.f32 %v772_v42  ;;  %v687_v25 = vmax.f32 %v685_v50, %v686_v62  ;;  %v692_v48 = vmax.f32 %v690_v51, %v691_v63 }
 0x17f   :  { %v1753_v5 = vpop.eup %1434  ;;  %v1755_v6 = vadd.f32 %v793_v1, %v792_v55  ;;  %v807_v7 = vrot.slane %v806_v4, 4  ;;  %v698_v8 = vrot.slane %v697_v3, 2  ;;  %v703_v9 = vrot.slane %v702_v53, 4 }
 0x180   :  { %v799_v10 = vsel %vm631_vm3, %v1753_v5, 0.0  ;;  %v751_v11 = vsub.f32 %v1711_v13, %v687_v25  ;;  %v693_v57 = vrot.slane %v692_v48, 1  ;;  %v610_v14 = vmul.f32 0.01, %v578_v59 }
 0x181   :  { %v795_v15 = vrot.slane %v1755_v6, 2  ;;  %v1761_v16 = vadd.f32 %v807_v7, %v806_v4  ;;  %v800_v17 = vrot.slane %v799_v10, 4  ;;  %v699_v18 = vmax.f32 %v697_v3, %v698_v8 }
 0x182   :  { %v1763_v2 = vpop.eup %1436  ;;  %v774_v22 = vmul.f32 1.442695, %v751_v11  ;;  %v694_v23 = vmax.f32 %v692_v48, %v693_v57  ;;  %v704_v26 = vmax.f32 %v702_v53, %v703_v9  ;;  %v1766_v28 = vsel %vm594_vm15, %v578_v59, %v610_v14  ;;  %v548_v9 = vpop.permute.xlu0 %547 }
 0x183   :  { %v809_v29 = vrot.slane %v1761_v16, 2  ;;  %v1769_v30 = vadd.f32 %v800_v17, %v799_v10  ;;  %v813_v13 = vsel %vm631_vm3, %v1763_v2, 0.0  ;;  %v700_v21 = vrot.slane %v699_v18, 1  ;;  %v550_v10 = vpop.permute.xlu1 %549 }
 0x184   :  { %v1773_v37 = vpop.eup %1438  ;;  %v814_v12 = vrot.slane %v813_v13, 4  ;;  %1444 = vpow2.f32 %v774_v22  ;;  %v752_v38 = vsub.f32 %v1720_v35, %v694_v23  ;;  %v705_v39 = vrot.slane %v704_v26, 2 }
 0x185   :  { %v802_v19 = vrot.slane %v1769_v30, 2  ;;  %v820_v20 = vsel %vm631_vm3, %v1773_v37, 0.0  ;;  %v701_v43 = vmax.f32 %v699_v18, %v700_v21  ;;  %v709_v45 = vsel %vm631_vm3, %v1766_v28, -inf }
 0x186   :  { %v1781_v24 = vpop.eup %1440  ;;  %v1783_v46 = vadd.f32 %v814_v12, %v813_v13  ;;  %v821_v47 = vrot.slane %v820_v20, 4  ;;  %v776_v49 = vmul.f32 1.442695, %v752_v38  ;;  %v706_v50 = vmax.f32 %v704_v26, %v705_v39 }
 0x187   :  { %v827_v35 = vsel %vm631_vm3, %v1781_v24, 0.0  ;;  %v753_v51 = vsub.f32 %v1725_v44, %v701_v43  ;;  %v710_v52 = vrot.slane %v709_v45, 4  ;;  %vm595_vm0 = vcmp.ge.f32.partialorder %v1738_v60, 0.0 }
 0x188   :  { %v816_v59 = vrot.slane %v1783_v46, 2  ;;  %v1790_v55 = vadd.f32 %v821_v47, %v820_v20  ;;  %v828_v42 = vrot.slane %v827_v35, 4  ;;  %1446 = vpow2.f32 %v776_v49 }
 0x189   :  { %v778_v62 = vmul.f32 1.442695, %v753_v51  ;;  %v707_v63 = vrot.slane %v706_v50, 1  ;;  %v711_v1 = vmax.f32 %v709_v45, %v710_v52  ;;  %v611_v3 = vmul.f32 0.01, %v1738_v60 }
 0x18a   :  { %v823_v53 = vrot.slane %v1790_v55, 2  ;;  %v1794_v4 = vadd.f32 %v828_v42, %v827_v35  ;;  %vm596_vm1 = vcmp.ge.f32.partialorder %v1743_v61, 0.0  ;;  %v612_v44 = vmul.f32 0.01, %v1743_v61 }
 0x18b   :  { %v1798_v25 = vpop.eup %1442  ;;  %1448 = vpow2.f32 %v778_v62  ;;  %v708_v48 = vmax.f32 %v706_v50, %v707_v63  ;;  %v712_v7 = vrot.slane %v711_v1, 2  ;;  %v1803_v8 = vsel %vm595_vm0, %v1738_v60, %v611_v3 }
 0x18c   :  { %v830_v11 = vrot.slane %v1794_v4, 2  ;;  %v834_v57 = vsel %vm631_vm3, %v1798_v25, 0.0  ;;  %v716_v14 = vsel %vm631_vm3, %v1803_v8, -inf  ;;  %v1811_v17 = vsel %vm596_vm1, %v1743_v61, %v612_v44 }
 0x18d   :  { %v835_v18 = vrot.slane %v834_v57, 4  ;;  %v754_v22 = vsub.f32 %v1732_v58, %v708_v48  ;;  %v713_v23 = vmax.f32 %v711_v1, %v712_v7  ;;  %v717_v26 = vrot.slane %v716_v14, 4 }
 0x18e   :  { %v723_v60 = vsel %vm631_vm3, %v1811_v17, -inf  ;;  %v581_v13 = vadd.f32 %v548_v9, %v1657_v40  ;;  %v582_v21 = vadd.f32 %v550_v10, %v346_v54  ;;  %v796_v12 = vadd.f32 %v795_v15, %v1755_v6 }
 0x18f   :  { %v1821_v38 = vadd.f32 %v835_v18, %v834_v57  ;;  %v780_v61 = vmul.f32 1.442695, %v754_v22  ;;  %v714_v39 = vrot.slane %v713_v23, 1  ;;  %v718_v20 = vmax.f32 %v716_v14, %v717_v26 }
 0x190   :  { %v724_v43 = vrot.slane %v723_v60, 4  ;;  %vm597_vm2 = vcmp.ge.f32.partialorder %v581_v13, 0.0  ;;  %v613_v58 = vmul.f32 0.01, %v581_v13  ;;  %vm598_vm4 = vcmp.ge.f32.partialorder %v582_v21, 0.0 }
 0x191   :  { %v1823_v45 = vpop.eup %1444  ;;  %v837_v47 = vrot.slane %v1821_v38, 2  ;;  %1450 = vpow2.f32 %v780_v61  ;;  %v715_v49 = vmax.f32 %v713_v23, %v714_v39  ;;  %v719_v50 = vrot.slane %v718_v20, 2 }
 0x192   :  { %v841_v54 = vsel %vm631_vm3, %v1823_v45, 0.0  ;;  %v725_v6 = vmax.f32 %v723_v60, %v724_v43  ;;  %v1828_v15 = vsel %vm597_vm2, %v581_v13, %v613_v58  ;;  %v614_v35 = vmul.f32 0.01, %v582_v21 }
 0x193   :  { %v842_v51 = vrot.slane %v841_v54, 4  ;;  %v755_v52 = vsub.f32 %v1766_v28, %v715_v49  ;;  %v720_v42 = vmax.f32 %v718_v20, %v719_v50  ;;  %v730_v62 = vsel %vm631_vm3, %v1828_v15, -inf }
 0x194   :  { %v726_v63 = vrot.slane %v725_v6, 2  ;;  %v731_v1 = vrot.slane %v730_v62, 4  ;;  %v1834_v3 = vsel %vm598_vm4, %v582_v21, %v614_v35  ;;  %v797_v44 = vrot.slane %v796_v12, 1 }
 0x195   :  { %v1836_v48 = vpop.eup %1446  ;;  %v843_v7 = vadd.f32 %v842_v51, %v841_v54  ;;  %v782_v9 = vmul.f32 1.442695, %v755_v52  ;;  %v721_v10 = vrot.slane %v720_v42, 1  ;;  %v737_v57 = vsel %vm631_vm3, %v1834_v3, -inf }
 0x196   :  { %v848_v28 = vsel %vm631_vm3, %v1836_v48, 0.0  ;;  %v727_v14 = vmax.f32 %v725_v6, %v726_v63  ;;  %v732_v18 = vmax.f32 %v730_v62, %v731_v1  ;;  %v738_v22 = vrot.slane %v737_v57, 4 }
 0x197   :  { %v844_v23 = vrot.slane %v843_v7, 2  ;;  %v849_v26 = vrot.slane %v848_v28, 4  ;;  %1452 = vpow2.f32 %v782_v9  ;;  %v722_v60 = vmax.f32 %v720_v42, %v721_v10 }
 0x198   :  { %v1842_v13 = vpop.eup %1448  ;;  %v728_v21 = vrot.slane %v727_v14, 1  ;;  %v733_v61 = vrot.slane %v732_v18, 2  ;;  %v739_v39 = vmax.f32 %v737_v57, %v738_v22  ;;  %v798_v20 = vadd.f32 %v797_v44, %v796_v12 }
 0x199   :  { %v850_v43 = vadd.f32 %v849_v26, %v848_v28  ;;  %v855_v58 = vsel %vm631_vm3, %v1842_v13, 0.0  ;;  %v756_v49 = vsub.f32 %v1803_v8, %v722_v60  ;;  %v803_v50 = vadd.f32 %v802_v19, %v1769_v30 }
 0x19a   :  { %v856_v54 = vrot.slane %v855_v58, 4  ;;  %v729_v6 = vmax.f32 %v727_v14, %v728_v21  ;;  %v734_v35 = vmax.f32 %v732_v18, %v733_v61  ;;  %v740_v51 = vrot.slane %v739_v39, 2 }
 0x19b   :  { %v851_v52 = vrot.slane %v850_v43, 2  ;;  %v784_v42 = vmul.f32 1.442695, %v756_v49  ;;  %v804_v62 = vrot.slane %v803_v50, 1  ;;  %1454 = vrcp.f32 %v798_v20 }
 0x19c   :  { %v857_v63 = vadd.f32 %v856_v54, %v855_v58  ;;  %v757_v12 = vsub.f32 %v1811_v17, %v729_v6  ;;  %v735_v1 = vrot.slane %v734_v35, 1  ;;  %v741_v44 = vmax.f32 %v739_v39, %v740_v51 }
 0x19d   :  { %1456 = vpow2.f32 %v784_v42  ;;  %v805_v9 = vadd.f32 %v804_v62, %v803_v50  ;;  %v810_v8 = vadd.f32 %v809_v29, %v1761_v16  ;;  %v817_v30 = vadd.f32 %v816_v59, %v1783_v46 }
 0x19e   :  { %v1857_v19 = vpop.eup %1450  ;;  %v858_v10 = vrot.slane %v857_v63, 2  ;;  %v786_v57 = vmul.f32 1.442695, %v757_v12  ;;  %v736_v28 = vmax.f32 %v734_v35, %v735_v1  ;;  %v742_v14 = vrot.slane %v741_v44, 1 }
 0x19f   :  { %v862_v17 = vsel %vm631_vm3, %v1857_v19, 0.0  ;;  %1458 = vrcp.f32 %v805_v9  ;;  %v811_v18 = vrot.slane %v810_v8, 1  ;;  %v818_v22 = vrot.slane %v817_v30, 1 }
 0x1a0   :  { %v863_v26 = vrot.slane %v862_v17, 4  ;;  %1460 = vpow2.f32 %v786_v57  ;;  %v758_v16 = vsub.f32 %v1828_v15, %v736_v28  ;;  %v743_v29 = vmax.f32 %v741_v44, %v742_v14 }
 0x1a1   :  { %v812_v60 = vadd.f32 %v811_v18, %v810_v8  ;;  %v819_v21 = vadd.f32 %v818_v22, %v817_v30  ;;  %v824_v46 = vadd.f32 %v823_v53, %v1790_v55  ;;  %v831_v59 = vadd.f32 %v830_v11, %v1794_v4 }
 0x1a2   :  { %v864_v61 = vadd.f32 %v863_v26, %v862_v17  ;;  %v788_v39 = vmul.f32 1.442695, %v758_v16  ;;  %v759_v20 = vsub.f32 %v1834_v3, %v743_v29  ;;  %v838_v58 = vadd.f32 %v837_v47, %v1821_v38  ;;  %v936_v47 = vld [vmem:[%s1972_s6] sm:$0x3]  ;;  %s1520_s6 = smov [#allocation2]  }
 0x1a3   :  { %1462 = vrcp.f32 %v812_v60  ;;  %v825_v15 = vrot.slane %v824_v46, 1  ;;  %v832_v49 = vrot.slane %v831_v59, 1  ;;  %v845_v50 = vadd.f32 %v844_v23, %v843_v7  ;;  %1391 = vmatprep.subr.msk.mxu1 %vm994_vm5, %v936_v47  ;;  %s1295_s26 = sshll.u32 %s1520_s6, 4  ;;  %s1296_s26 = int_to_ptr.vmem [resolvable:$true] %s1295_s26 }
 0x1a4   :  { %v1872_v54 = vpop.eup %1452  ;;  %v865_v6 = vrot.slane %v864_v61, 2  ;;  %1464 = vpow2.f32 %v788_v39  ;;  %v790_v55 = vmul.f32 1.442695, %v759_v20  ;;  %v839_v53 = vrot.slane %v838_v58, 1  ;;  %1392 = vmatpush3.msk.msra.mxu1 %vm994_vm5, %v936_v47  ;;  %s1494_s27 = scalar_lea.vmem %s1296_s26, 256  ;;  %p1499_p1 = scmp.lt.s32.totalorder %s1296_s26, %s1296_s26 }
 0x1a5   :  { %v869_v4 = vsel %vm631_vm3, %v1872_v54, 0.0  ;;  %1466 = vrcp.f32 %v819_v21  ;;  %v826_v11 = vadd.f32 %v825_v15, %v824_v46  ;;  %v833_v3 = vadd.f32 %v832_v49, %v831_v59  ;;  %p1495_p0 = scmp.ne.s32.totalorder %s1296_s26, %s1494_s27  ;;  %p1500_p2 = scmp.lt.s32.totalorder %s1494_s27, %s1494_s27 }
 0x1a6   :  { %v870_v35 = vrot.slane %v869_v4, 4  ;;  %1468 = vpow2.f32 %v790_v55  ;;  %v840_v51 = vadd.f32 %v839_v53, %v838_v58  ;;  %v846_v38 = vrot.slane %v845_v50, 1 }
 0x1a7   :  { %1470 = vrcp.f32 %v826_v11  ;;  %v852_v7 = vadd.f32 %v851_v52, %v850_v43  ;;  %v859_v23 = vadd.f32 %v858_v10, %v857_v63  ;;  %v866_v42 = vadd.f32 %v865_v6, %v864_v61  ;;  %p1501_p3 = por %p1500_p2, %p1499_p1 }
 0x1a8   :  { %v1455_v62 = vpop.eup %1454  ;;  %v871_v12 = vadd.f32 %v870_v35, %v869_v4  ;;  %1472 = vrcp.f32 %v833_v3  ;;  %v847_v1 = vadd.f32 %v846_v38, %v845_v50  ;;  %vm1266_vm8 = vcmask 1042434  }
 0x1a9   :  { %1474 = vrcp.f32 %v840_v51  ;;  %v853_v44 = vrot.slane %v852_v7, 1  ;;  %v860_v9 = vrot.slane %v859_v23, 1  ;;  %v867_v57 = vrot.slane %v866_v42, 1  ;;  %p1502_p4 = pnand %p1501_p3, %p1495_p0 }
 0x1aa   :  { %v1879_v8 = vpop.eup %1456  ;;  %v872_v30 = vrot.slane %v871_v12, 2  ;;  %1476 = vrcp.f32 %v847_v1  ;;  %v920_v22 = vmul.f32 %v1455_v62, %v1730_v56  ;;  %vm1268_vm9 = vcmask 1043459  }
 0x1ab   :  { %v876_v43 = vsel %vm631_vm3, %v1879_v8, 0.0  ;;  %v854_v52 = vadd.f32 %v853_v44, %v852_v7  ;;  %v861_v63 = vadd.f32 %v860_v9, %v859_v23  ;;  %v868_v14 = vadd.f32 %v867_v57, %v866_v42 }
 0x1ac   :  { %v1459_v10 = vpop.eup %1458  ;;  %v877_v28 = vrot.slane %v876_v43, 4  ;;  %v873_v17 = vadd.f32 %v872_v30, %v871_v12  ;;  %vm1270_vm10 = vcmask 1044484   ;;  %vm1272_vm11 = vcmask 1045509  }
 0x1ad   :  { %v1883_v18 = vpop.eup %1460  ;;  %v921_v26 = vmul.f32 %v1459_v10, %v1753_v5  ;;  %1478 = vrcp.f32 %v854_v52  ;;  %vm1274_vm12 = vcmask 1046534   ;;  %vm1276_vm13 = vcmask 1047559  }
 0x1ae   :  { %v878_v16 = vadd.f32 %v877_v28, %v876_v43  ;;  %v883_v29 = vsel %vm631_vm3, %v1883_v18, 0.0  ;;  %1480 = vrcp.f32 %v861_v63  ;;  %v874_v60 = vrot.slane %v873_v17, 1 }
 0x1af   :  { %v884_v21 = vrot.slane %v883_v29, 4  ;;  %v953_v46 = vcombine.low %v920_v22, %v921_v26  ;;  %1482 = vrcp.f32 %v868_v14  ;;  %vm1287_vm14 = vcmask 523264  }
 0x1b0   :  { %v1463_v59 = vpop.eup %1462  ;;  %v879_v61 = vrot.slane %v878_v16, 2  ;;  %v875_v39 = vadd.f32 %v874_v60, %v873_v17 }
 0x1b1   :  { %v1889_v20 = vpop.eup %1464  ;;  %v885_v58 = vadd.f32 %v884_v21, %v883_v29  ;;  %961 = vrot.lane.b32.xlu0 %v953_v46, %s1519_s0  ;;  %v922_v55 = vmul.f32 %v1463_v59, %v1747_v0 }
 0x1b2   :  { %v1467_v56 = vpop.eup %1466  ;;  %v890_v5 = vsel %vm631_vm3, %v1889_v20, 0.0  ;;  %1484 = vrcp.f32 %v875_v39  ;;  %v880_v15 = vadd.f32 %v879_v61, %v878_v16 }
 0x1b3   :  { %v1469_v49 = vpop.eup %1468  ;;  %v886_v50 = vrot.slane %v885_v58, 2  ;;  %v891_v6 = vrot.slane %v890_v5, 4  ;;  %v923_v53 = vmul.f32 %v1467_v56, %v1763_v2 }
 0x1b4   :  { %v1471_v4 = vpop.eup %1470  ;;  %v897_v11 = vsel %vm631_vm3, %v1469_v49, 0.0  ;;  %v881_v3 = vrot.slane %v880_v15, 1  ;;  %vm977_vm3 = vcmask 15360  }
 0x1b5   :  { %v1473_v35 = vpop.eup %1472  ;;  %v892_v51 = vadd.f32 %v891_v6, %v890_v5  ;;  %v898_v38 = vrot.slane %v897_v11, 4  ;;  %v954_v47 = vcombine.low %v922_v55, %v923_v53  ;;  %v924_v23 = vmul.f32 %v1471_v4, %v1773_v37 }
 0x1b6   :  { %v1475_v7 = vpop.eup %1474  ;;  %v925_v42 = vmul.f32 %v1473_v35, %v1781_v24  ;;  %v882_v62 = vadd.f32 %v881_v3, %v880_v15  ;;  %v887_v12 = vadd.f32 %v886_v50, %v885_v58 }
 0x1b7   :  { %v1477_v1 = vpop.eup %1476  ;;  %v893_v44 = vrot.slane %v892_v51, 2  ;;  %v899_v0 = vadd.f32 %v898_v38, %v897_v11  ;;  %963 = vrot.lane.b32.xlu1 %v954_v47, %s1519_s0  ;;  %v926_v9 = vmul.f32 %v1475_v7, %v1798_v25 }
 0x1b8   :  { %v955_v2 = vcombine.low %v924_v23, %v925_v42  ;;  %v927_v30 = vmul.f32 %v1477_v1, %v1823_v45  ;;  %v888_v57 = vrot.slane %v887_v12, 1  ;;  %1486 = vrcp.f32 %v882_v62 }
 0x1b9   :  { %v900_v43 = vrot.slane %v899_v0, 2  ;;  %v894_v52 = vadd.f32 %v893_v44, %v892_v51 }
 0x1ba   :  { %v1479_v63 = vpop.eup %1478  ;;  %965 = vrot.lane.b32.xlu0 %v955_v2, %s1519_s0  ;;  %v956_v37 = vcombine.low %v926_v9, %v927_v30  ;;  %v889_v24 = vadd.f32 %v888_v57, %v887_v12 }
 0x1bb   :  { %v1481_v10 = vpop.eup %1480  ;;  %v895_v28 = vrot.slane %v894_v52, 1  ;;  %v901_v14 = vadd.f32 %v900_v43, %v899_v0  ;;  %v928_v17 = vmul.f32 %v1479_v63, %v1836_v48 }
 0x1bc   :  { %967 = vrot.lane.b32.xlu1 %v956_v37, %s1519_s0  ;;  %v929_v25 = vmul.f32 %v1481_v10, %v1842_v13  ;;  %1488 = vrcp.f32 %v889_v24  ;;  %v1483_v45 = vpop.eup %1482 }
 0x1bd   :  { %v896_v22 = vadd.f32 %v895_v28, %v894_v52  ;;  %v902_v26 = vrot.slane %v901_v14, 1  ;;  %v930_v21 = vmul.f32 %v1483_v45, %v1857_v19 }
 0x1be   :  { %v957_v16 = vcombine.low %v928_v17, %v929_v25 }
 0x1bf   :  { %v1485_v29 = vpop.eup %1484  ;;  %v903_v60 = vadd.f32 %v902_v26, %v901_v14  ;;  %1490 = vrcp.f32 %v896_v22 }
 0x1c0   :  { %969 = vrot.lane.b32.xlu0 %v957_v16, %s1519_s0  ;;  %v931_v46 = vmul.f32 %v1485_v29, %v1872_v54 }
 0x1c1   :  { %1492 = vrcp.f32 %v903_v60 }
 0x1c2   :  { %v958_v59 = vcombine.low %v930_v21, %v931_v46 }
 0x1c4   :  { %971 = vrot.lane.b32.xlu1 %v958_v59, %s1519_s0 }
 0x1c5   :  { %v1487_v48 = vpop.eup %1486 }
 0x1c6   :  { %v932_v61 = vmul.f32 %v1487_v48, %v1879_v8 }
 0x1c9   :  { %v1489_v13 = vpop.eup %1488 }
 0x1ca   :  { %v933_v39 = vmul.f32 %v1489_v13, %v1883_v18 }
 0x1cc   :  { %v1491_v58 = vpop.eup %1490  ;;  %v959_v56 = vcombine.low %v932_v61, %v933_v39 }
 0x1cd   :  { %v934_v15 = vmul.f32 %v1491_v58, %v1889_v20 }
 0x1ce   :  { %v1493_v5 = vpop.eup %1492  ;;  %973 = vrot.lane.b32.xlu0 %v959_v56, %s1519_s0 }
 0x1cf   :  { %v935_v19 = vmul.f32 %v1493_v5, %v1469_v49 }
 0x1d1   :  { %v960_v50 = vcombine.low %v934_v15, %v935_v19 }
 0x1d3   :  { %975 = vrot.lane.b32.xlu1 %v960_v50, %s1519_s0 }
 0x223   :  { %v962_v54 = vpop.permute.xlu0 %961 }
 0x224   :  { %1393 = vmatprep.mubr.msk.f32.mxu1 %vm977_vm3, %v962_v54 }
 0x229   :  { %v964_v6 = vpop.permute.xlu1 %963 }
 0x22a   :  { %1394 = vmatmul.mubr.msk.f32.vlgmr.msra.gmra.mxu1 %vm977_vm3, %v964_v6 }
 0x22c   :  { %v966_v8 = vpop.permute.xlu0 %965 }
 0x22d   :  { %1396 = vmatprep.mubr.msk.f32.mxu1 %vm977_vm3, %v966_v8 }
 0x22e   :  { %v968_v18 = vpop.permute.xlu1 %967 }
 0x22f   :  { %1397 = vmatmul.mubr.msk.f32.gmra.mxu1 %vm977_vm3, %v968_v18 }
 0x232   :  { %v970_v55 = vpop.permute.xlu0 %969 }
 0x233   :  { %1399 = vmatprep.mubr.msk.f32.mxu1 %vm977_vm3, %v970_v55 }
 0x236   :  { %v972_v20 = vpop.permute.xlu1 %971 }
 0x237   :  { %1400 = vmatmul.mubr.msk.f32.gmra.mxu1 %vm977_vm3, %v972_v20 }
 0x240   :  { %v974_v49 = vpop.permute.xlu0 %973 }
 0x241   :  { %1402 = vmatprep.mubr.msk.f32.mxu1 %vm977_vm3, %v974_v49 }
 0x245   :  { %v976_v53 = vpop.permute.xlu1 %975 }
 0x246   :  { %1403 = vmatmul.mubr.msk.f32.gmra.mxu1 %vm977_vm3, %v976_v53 }
 0x2ea   :  { %v1395_v4 = vpop.f32.mrf.mxu1 }
 0x2eb   :  { %v1104_v11 = vmul.f32 %v1395_v4, %v1628_v36 }
 0x2ec   :  { %v1064_v3 = vpop.f32.mrf.mxu1 }
 0x2ed   :  { %v1120_v35 = vcombine.high %v1104_v11, %v1104_v11  ;;  %v1150_v51 = vsel %vm1135_vm6, %v1104_v11, 0.0  ;;  %v1103_v38 = vmul.f32 %v1064_v3, %v1624_v31 }
 0x2ee   :  { %v1151_v47 = vrot.slane %v1150_v51, 4 }
 0x2ef   :  { %v1157_v7 = vsel %vm1135_vm6, %v1120_v35, 0.0  ;;  %v1119_v23 = vcombine.high %v1103_v38, %v1103_v38  ;;  %v1136_v42 = vsel %vm1135_vm6, %v1103_v38, 0.0  ;;  %v1398_v62 = vpop.f32.mrf.mxu1 }
 0x2f0   :  { %v1152_v12 = vadd.f32 %v1151_v47, %v1150_v51  ;;  %v1158_v1 = vrot.slane %v1157_v7, 4  ;;  %v1137_v44 = vrot.slane %v1136_v42, 4  ;;  %v1106_v0 = vmul.f32 %v1398_v62, %v1626_v33 }
 0x2f1   :  { %v1143_v36 = vsel %vm1135_vm6, %v1119_v23, 0.0  ;;  %v1074_v2 = vpop.f32.mrf.mxu1 }
 0x2f2   :  { %v1153_v9 = vrot.slane %v1152_v12, 2  ;;  %v1159_v30 = vadd.f32 %v1158_v1, %v1157_v7  ;;  %v1138_v57 = vadd.f32 %v1137_v44, %v1136_v42  ;;  %v1144_v43 = vrot.slane %v1143_v36, 4 }
 0x2f3   :  { %v1122_v31 = vcombine.high %v1106_v0, %v1106_v0  ;;  %v1178_v52 = vsel %vm1135_vm6, %v1106_v0, 0.0  ;;  %v1105_v63 = vmul.f32 %v1074_v2, %v1622_v27 }
 0x2f4   :  { %v1154_v37 = vadd.f32 %v1153_v9, %v1152_v12  ;;  %v1160_v24 = vrot.slane %v1159_v30, 2  ;;  %v1139_v10 = vrot.slane %v1138_v57, 2  ;;  %v1145_v28 = vadd.f32 %v1144_v43, %v1143_v36 }
 0x2f5   :  { %v1179_v14 = vrot.slane %v1178_v52, 4  ;;  %v1185_v17 = vsel %vm1135_vm6, %v1122_v31, 0.0  ;;  %v1121_v33 = vcombine.high %v1105_v63, %v1105_v63  ;;  %v1164_v25 = vsel %vm1135_vm6, %v1105_v63, 0.0 }
 0x2f6   :  { %v1155_v45 = vrot.slane %v1154_v37, 1  ;;  %v1161_v22 = vadd.f32 %v1160_v24, %v1159_v30  ;;  %v1140_v26 = vadd.f32 %v1139_v10, %v1138_v57  ;;  %v1146_v16 = vrot.slane %v1145_v28, 2 }
 0x2f7   :  { %v1180_v29 = vadd.f32 %v1179_v14, %v1178_v52  ;;  %v1186_v60 = vrot.slane %v1185_v17, 4  ;;  %v1165_v21 = vrot.slane %v1164_v25, 4  ;;  %v1171_v46 = vsel %vm1135_vm6, %v1121_v33, 0.0  ;;  %v1401_v27 = vpop.f32.mrf.mxu1 }
 0x2f8   :  { %v1141_v59 = vrot.slane %v1140_v26, 1  ;;  %v1147_v48 = vadd.f32 %v1146_v16, %v1145_v28  ;;  %v1172_v58 = vrot.slane %v1171_v46, 4  ;;  %v1156_v5 = vadd.f32 %v1155_v45, %v1154_v37 }
 0x2f9   :  { %v1181_v13 = vrot.slane %v1180_v29, 2  ;;  %v1187_v61 = vadd.f32 %v1186_v60, %v1185_v17  ;;  %v1166_v39 = vadd.f32 %v1165_v21, %v1164_v25  ;;  %v1084_v56 = vpop.f32.mrf.mxu1  ;;  %v1162_v15 = vrot.slane %v1161_v22, 1 }
 0x2fa   :  { %v1148_v19 = vrot.slane %v1147_v48, 1  ;;  %v1108_v50 = vmul.f32 %v1401_v27, %v1660_v41  ;;  %v1142_v54 = vadd.f32 %v1141_v59, %v1140_v26  ;;  %v1173_v18 = vadd.f32 %v1172_v58, %v1171_v46 }
 0x2fb   :  { %v1188_v6 = vrot.slane %v1187_v61, 2  ;;  %v1167_v8 = vrot.slane %v1166_v39, 2  ;;  %v1107_v53 = vmul.f32 %v1084_v56, %v1651_v34  ;;  %v1182_v4 = vadd.f32 %v1181_v13, %v1180_v29 }
 0x2fc   :  { %v1149_v55 = vadd.f32 %v1148_v19, %v1147_v48  ;;  %v1124_v20 = vcombine.high %v1108_v50, %v1108_v50  ;;  %v1206_v49 = vsel %vm1135_vm6, %v1108_v50, 0.0  ;;  %v1174_v35 = vrot.slane %v1173_v18, 2 }
 0x2fd   :  { %v1189_v11 = vadd.f32 %v1188_v6, %v1187_v61  ;;  %v1168_v3 = vadd.f32 %v1167_v8, %v1166_v39  ;;  %v1207_v38 = vrot.slane %v1206_v49, 4  ;;  %v1123_v41 = vcombine.high %v1107_v53, %v1107_v53 }
 0x2fe   :  { %v1265_v51 = vsel %vm1264_vm7, %v1149_v55, %v1142_v54  ;;  %v1213_v47 = vsel %vm1135_vm6, %v1124_v20, 0.0  ;;  %v1163_v42 = vadd.f32 %v1162_v15, %v1161_v22  ;;  %v1175_v62 = vadd.f32 %v1174_v35, %v1173_v18 }
 0x2ff   :  { %v1267_v7 = vsel %vm1266_vm8, %v1156_v5, %v1265_v51  ;;  %v1169_v23 = vrot.slane %v1168_v3, 1  ;;  %v1208_v12 = vadd.f32 %v1207_v38, %v1206_v49  ;;  %v1214_v1 = vrot.slane %v1213_v47, 4 }
 0x300   :  { %v1183_v34 = vrot.slane %v1182_v4, 1  ;;  %v1192_v0 = vsel %vm1135_vm6, %v1107_v53, 0.0  ;;  %v1199_v36 = vsel %vm1135_vm6, %v1123_v41, 0.0  ;;  %v1190_v2 = vrot.slane %v1189_v11, 1 }
 0x301   :  { %v1170_v44 = vadd.f32 %v1169_v23, %v1168_v3  ;;  %v1176_v9 = vrot.slane %v1175_v62, 1  ;;  %v1269_v30 = vsel %vm1268_vm9, %v1163_v42, %v1267_v7  ;;  %v1193_v57 = vrot.slane %v1192_v0, 4 }
 0x302   :  { %v1200_v31 = vrot.slane %v1199_v36, 4  ;;  %v1209_v63 = vrot.slane %v1208_v12, 2  ;;  %v1215_v37 = vadd.f32 %v1214_v1, %v1213_v47  ;;  %v1184_v10 = vadd.f32 %v1183_v34, %v1182_v4 }
 0x303   :  { %v1271_v43 = vsel %vm1270_vm10, %v1170_v44, %v1269_v30  ;;  %v1177_v52 = vadd.f32 %v1176_v9, %v1175_v62  ;;  %v1194_v24 = vadd.f32 %v1193_v57, %v1192_v0  ;;  %v1191_v14 = vadd.f32 %v1190_v2, %v1189_v11 }
 0x304   :  { %v1201_v28 = vadd.f32 %v1200_v31, %v1199_v36  ;;  %v1210_v16 = vadd.f32 %v1209_v63, %v1208_v12  ;;  %v1216_v29 = vrot.slane %v1215_v37, 2 }
 0x305   :  { %v1195_v17 = vrot.slane %v1194_v24, 2  ;;  %v1273_v25 = vsel %vm1272_vm11, %v1177_v52, %v1271_v43 }
 0x306   :  { %v1404_v33 = vpop.f32.mrf.mxu1  ;;  %v1202_v45 = vrot.slane %v1201_v28, 2  ;;  %v1275_v26 = vsel %vm1274_vm12, %v1184_v10, %v1273_v25  ;;  %v1211_v54 = vrot.slane %v1210_v16, 1  ;;  %v1217_v6 = vadd.f32 %v1216_v29, %v1215_v37 }
 0x307   :  { %v1110_v22 = vmul.f32 %v1404_v33, %v1657_v40  ;;  %v1196_v60 = vadd.f32 %v1195_v17, %v1194_v24  ;;  %v1277_v46 = vsel %vm1276_vm13, %v1191_v14, %v1275_v26 }
 0x308   :  { %v1094_v21 = vpop.f32.mrf.mxu1  ;;  %v1203_v27 = vadd.f32 %v1202_v45, %v1201_v28  ;;  %1288 = vst.msk [vmem:[#allocation2] sm:$0xff] %vm1287_vm14, %v1277_v46  ;;  %v1218_v3 = vrot.slane %v1217_v6, 1  ;;  %v1212_v38 = vadd.f32 %v1211_v54, %v1210_v16 }
 0x309   :  { %v1126_v59 = vcombine.high %v1110_v22, %v1110_v22  ;;  %v1234_v48 = vsel %vm1135_vm6, %v1110_v22, 0.0  ;;  %v1109_v13 = vmul.f32 %v1094_v21, %v1648_v32  ;;  %v1197_v61 = vrot.slane %v1196_v60, 1 }
 0x30a   :  { %v1235_v39 = vrot.slane %v1234_v48, 4  ;;  %v1204_v58 = vrot.slane %v1203_v27, 1  ;;  %v1219_v12 = vadd.f32 %v1218_v3, %v1217_v6 }
 0x30b   :  { %v1241_v40 = vsel %vm1135_vm6, %v1126_v59, 0.0  ;;  %v1125_v56 = vcombine.high %v1109_v13, %v1109_v13  ;;  %v1220_v5 = vsel %vm1135_vm6, %v1109_v13, 0.0  ;;  %v1198_v53 = vadd.f32 %v1197_v61, %v1196_v60 }
 0x30c   :  { %v1236_v15 = vadd.f32 %v1235_v39, %v1234_v48  ;;  %v1242_v19 = vrot.slane %v1241_v40, 4  ;;  %v1221_v50 = vrot.slane %v1220_v5, 4  ;;  %v1205_v8 = vadd.f32 %v1204_v58, %v1203_v27 }
 0x30d   :  { %v1227_v18 = vsel %vm1135_vm6, %v1125_v56, 0.0 }
 0x30e   :  { %v1237_v55 = vrot.slane %v1236_v15, 2  ;;  %v1243_v32 = vadd.f32 %v1242_v19, %v1241_v40  ;;  %v1222_v20 = vadd.f32 %v1221_v50, %v1220_v5  ;;  %v1228_v49 = vrot.slane %v1227_v18, 4 }
 0x30f   :  { %v1278_v35 = vsel %vm1264_vm7, %v1205_v8, %v1198_v53 }
 0x310   :  { %v1244_v4 = vrot.slane %v1243_v32, 2  ;;  %v1223_v11 = vrot.slane %v1222_v20, 2  ;;  %v1229_v51 = vadd.f32 %v1228_v49, %v1227_v18  ;;  %v1238_v47 = vadd.f32 %v1237_v55, %v1236_v15 }
 0x311   :  { %v1279_v42 = vsel %vm1266_vm8, %v1212_v38, %v1278_v35 }
 0x312   :  { %v1224_v41 = vadd.f32 %v1223_v11, %v1222_v20  ;;  %v1245_v7 = vadd.f32 %v1244_v4, %v1243_v32  ;;  %v1230_v23 = vrot.slane %v1229_v51, 2  ;;  %v1239_v34 = vrot.slane %v1238_v47, 1 }
 0x313   :  { %v1280_v2 = vsel %vm1268_vm9, %v1219_v12, %v1279_v42 }
 0x314   :  { %v1225_v62 = vrot.slane %v1224_v41, 1  ;;  %v1231_v1 = vadd.f32 %v1230_v23, %v1229_v51  ;;  %v1246_v0 = vrot.slane %v1245_v7, 1  ;;  %v1240_v57 = vadd.f32 %v1239_v34, %v1238_v47 }
 0x316   :  { %v1226_v44 = vadd.f32 %v1225_v62, %v1224_v41  ;;  %v1232_v36 = vrot.slane %v1231_v1, 1  ;;  %v1247_v43 = vadd.f32 %v1246_v0, %v1245_v7 }
 0x318   :  { %v1281_v9 = vsel %vm1270_vm10, %v1226_v44, %v1280_v2  ;;  %v1233_v30 = vadd.f32 %v1232_v36, %v1231_v1 }
 0x31a   :  { %v1282_v31 = vsel %vm1272_vm11, %v1233_v30, %v1281_v9 }
 0x31b   :  { %v1283_v52 = vsel %vm1274_vm12, %v1240_v57, %v1282_v31 }
 0x31c   :  { %v1284_v63 = vsel %vm1276_vm13, %v1247_v43, %v1283_v52 }
 0x31d   :  { %1289 = vst.msk [vmem:[#allocation2 + $0x8] sm:$0xff] %vm1287_vm14, %v1284_v63 }
 0x31e   :  { %1505 = shalt.err (!%p1502_p4)
}
 0x31f   :  { %s1521_s28 = smov 128   ;;  %s1522_s29 = smov 8  }
 0x320   :  { %1301 = dma.vmem_to_hbm [thread:$0]  %s1296_s26, 256, %s1973_s7, [#allocation3], %s1521_s28, %s1521_s28, %s1522_s29  }
 0x321   :  { %1514 = dma.done.wait [#allocation3], 256  }
 0x322   :  { %1515 = vsyncadd [#allocation3], 4294967040 }
 0x323   :  { %1305 = vsyncpa [#allocation3], 1 }

</bundles_post_ra>
